<compile_context>
chip_gen: v7x
topology: tpu7x:2x2x1
jax: 0.10.0
libtpu: 0.0.40
codegen_flags: <defaults>
</compile_context>

<pallas_src>
import math

import jax
import jax.numpy as jnp
from jax import lax
from jax.experimental import pallas as pl
from jax.experimental.pallas import tpu as pltpu

# ----------------------------- config (small) ------------------------------
BSZ, SEQ = 2, 8
HIDDEN = 128                  # config.hidden_size
NUM_HEADS = 4                 # config.num_attention_heads
HEAD_DIM = 32                 # config.head_dim
NUM_KV_HEADS = 2              # config.num_key_value_heads (GQA)
KV_GROUPS = NUM_HEADS // NUM_KV_HEADS
QKV_DIM = (NUM_HEADS + 2 * NUM_KV_HEADS) * HEAD_DIM     # 256
ROPE_THETA = 10000.0          # config.rope_theta
MASK_VALUE = -1e9             # additive causal-mask fill

N_ROWS = BSZ * SEQ                    # batch*seq folded into sublanes (16)
Q_WIDTH = NUM_HEADS * HEAD_DIM        # 128 (lane-dense)
K_WIDTH = NUM_KV_HEADS * HEAD_DIM     # 64
HALF = HEAD_DIM // 2
GROUP_ROWS = KV_GROUPS * SEQ          # row-stacked query heads per kv group (16)

# Fused projection column layout: [Q | rot_half(Q) | K | rot_half(K) | V]
OFF_Q, OFF_QR = 0, Q_WIDTH
OFF_K = 2 * Q_WIDTH
OFF_KR = OFF_K + K_WIDTH
OFF_V = OFF_KR + K_WIDTH
PROJ_W = OFF_V + K_WIDTH              # 448


# -------------------------------- kernel -----------------------------------
def attention_kernel(x_ref, cq_ref, sq_ref, ck_ref, sk_ref,
                     w_ref, b_ref, wd_ref, bd_ref, o_ref, attn_scr):
    # One MXU matmul produces Q, rotate_half(Q), K, rotate_half(K) and V.
    proj = jnp.dot(x_ref[...], w_ref[...],
                   preferred_element_type=jnp.float32) + b_ref[...]      # (N, 448)

    # RoPE on lane-dense slabs (1/sqrt(head_dim) pre-folded into cq/sq).
    q_emb = (proj[:, OFF_Q:OFF_Q + Q_WIDTH] * cq_ref[...]
             + proj[:, OFF_QR:OFF_QR + Q_WIDTH] * sq_ref[...])           # (N, 128)
    k_emb = (proj[:, OFF_K:OFF_K + K_WIDTH] * ck_ref[...]
             + proj[:, OFF_KR:OFF_KR + K_WIDTH] * sk_ref[...])           # (N, 64)
    v = proj[:, OFF_V:OFF_V + K_WIDTH]                                   # (N, 64)

    # Causal additive mask, generated in-kernel, tiled over the stacked heads.
    qpos = lax.broadcasted_iota(jnp.int32, (SEQ, SEQ), 0)
    kpos = lax.broadcasted_iota(jnp.int32, (SEQ, SEQ), 1)
    causal = jnp.where(qpos >= kpos, 0.0, MASK_VALUE).astype(jnp.float32)
    mask = jnp.tile(causal, (KV_GROUPS, 1))                              # (KG*S, S)

    qk_dims = (((1,), (1,)), ((), ()))   # contract head_dim of both operands

    for b in range(BSZ):                 # static unroll (tiny shapes)
        r0, r1 = b * SEQ, (b + 1) * SEQ
        for g in range(NUM_KV_HEADS):
            h0 = g * KV_GROUPS
            # Row-stack the group's query heads -> one bigger MXU dot per group.
            q_stack = jnp.concatenate(
                [q_emb[r0:r1, (h0 + j) * HEAD_DIM:(h0 + j + 1) * HEAD_DIM]
                 for j in range(KV_GROUPS)], axis=0)                     # (KG*S, hd)
            k_g = k_emb[r0:r1, g * HEAD_DIM:(g + 1) * HEAD_DIM]          # (S, hd)
            v_g = v[r0:r1, g * HEAD_DIM:(g + 1) * HEAD_DIM]              # (S, hd)

            s = lax.dot_general(q_stack, k_g, qk_dims,
                                preferred_element_type=jnp.float32) + mask
            m = jnp.max(s, axis=-1, keepdims=True)                       # f32 softmax
            e = jnp.exp(s - m)
            p = e * pl.reciprocal(jnp.sum(e, axis=-1, keepdims=True), approx=True)
            pv = jnp.dot(p, v_g, preferred_element_type=jnp.float32)     # (KG*S, hd)

            # Place each head's PV block directly at its lane offset (no concat).
            for j in range(KV_GROUPS):
                h = h0 + j
                attn_scr[r0:r1, h * HEAD_DIM:(h + 1) * HEAD_DIM] = \
                    pv[j * SEQ:(j + 1) * SEQ, :]

    # Output projection on the lane-dense (N, 128) slab.
    y = jnp.dot(attn_scr[...], wd_ref[...],
                preferred_element_type=jnp.float32) + bd_ref[...]
    o_ref[...] = y.astype(o_ref.dtype)


# ------------------------------- wrapper ------------------------------------
def make_rope_cache(seq_len, dim, base):
    """BailingMoeRotaryEmbedding cos/sin caches (module buffers)."""
    inv_freq = 1.0 / (base ** (jnp.arange(0, dim, 2, dtype=jnp.float32) / dim))
    t = jnp.arange(seq_len, dtype=jnp.float32)
    freqs = jnp.outer(t, inv_freq)
    emb = jnp.concatenate([freqs, freqs], axis=-1)
    return jnp.cos(emb), jnp.sin(emb)


def _rotate_half_cols(w):
    """Fold rotate_half into projection columns: x @ _rotate_half_cols(W) == rotate_half(x @ W)."""
    lead, width = w.shape
    w3 = w.reshape(lead, width // HEAD_DIM, HEAD_DIM)
    out = jnp.concatenate([-w3[..., HALF:], w3[..., :HALF]], axis=-1)
    return out.reshape(lead, width)


@jax.jit
def bailing_moe_attention(hidden_states, position_ids, params):
    """Mirrors BailingMoeAttention.forward (eval, causal prefill, no cache, default RoPE)."""
    B, S, H = hidden_states.shape
    x2d = hidden_states.reshape(B * S, H)

    # RoPE tables gathered by position_ids, tiled to slab widths; Q scale folded in.
    cos_cache, sin_cache = make_rope_cache(S, HEAD_DIM, ROPE_THETA)
    cos = cos_cache[position_ids].reshape(B * S, HEAD_DIM)
    sin = sin_cache[position_ids].reshape(B * S, HEAD_DIM)
    scale = 1.0 / math.sqrt(HEAD_DIM)
    cos_q = jnp.tile(cos, (1, NUM_HEADS)) * scale
    sin_q = jnp.tile(sin, (1, NUM_HEADS)) * scale
    cos_k = jnp.tile(cos, (1, NUM_KV_HEADS))
    sin_k = jnp.tile(sin, (1, NUM_KV_HEADS))

    # Fused projection weight [Q | rot_half(Q) | K | rot_half(K) | V], (H, 448).
    wqkv, bqkv = params["wqkv"], params["bqkv"]
    wq, wk, wv = (wqkv[:, :Q_WIDTH], wqkv[:, Q_WIDTH:Q_WIDTH + K_WIDTH],
                  wqkv[:, Q_WIDTH + K_WIDTH:])
    bq, bk, bv = (bqkv[:, :Q_WIDTH], bqkv[:, Q_WIDTH:Q_WIDTH + K_WIDTH],
                  bqkv[:, Q_WIDTH + K_WIDTH:])
    w_all = jnp.concatenate(
        [wq, _rotate_half_cols(wq), wk, _rotate_half_cols(wk), wv], axis=1)
    b_all = jnp.concatenate(
        [bq, _rotate_half_cols(bq), bk, _rotate_half_cols(bk), bv], axis=1)

    out2d = pl.pallas_call(
        attention_kernel,
        out_shape=jax.ShapeDtypeStruct((B * S, H), jnp.float32),
        scratch_shapes=[pltpu.VMEM((B * S, Q_WIDTH), jnp.float32)],
    )(x2d, cos_q, sin_q, cos_k, sin_k, w_all, b_all,
      params["wdense"], params["bdense"])

    # module returns (attn_output, attn_weights=None, past_key_value=None)
    return out2d.reshape(B, S, H)


# ----------------------------- params / inputs ------------------------------
def init_params(key):
    ks = jax.random.split(key, 4)

    def uni(k, shape, fan_in):
        bound = 1.0 / jnp.sqrt(jnp.float32(fan_in))
        return jax.random.uniform(k, shape, jnp.float32, -bound, bound)

    # weights stored pre-transposed as (in_features, out_features)
    return dict(
        wqkv=uni(ks[0], (HIDDEN, QKV_DIM), HIDDEN),                    # query_key_value.weight^T
        bqkv=uni(ks[1], (1, QKV_DIM), HIDDEN),                         # query_key_value.bias
        wdense=uni(ks[2], (NUM_HEADS * HEAD_DIM, HIDDEN), NUM_HEADS * HEAD_DIM),  # dense.weight^T
        bdense=uni(ks[3], (1, HIDDEN), NUM_HEADS * HEAD_DIM),          # dense.bias
    )


def ref_forward(hidden_states, position_ids, attention_mask, params):
    """Pure-JAX reference of BailingMoeAttention.forward for a sanity check."""
    B, S, H = hidden_states.shape
    qkv = hidden_states @ params["wqkv"] + params["bqkv"][0]
    qkv = qkv.reshape(B, S, NUM_HEADS + 2 * NUM_KV_HEADS, HEAD_DIM)
    q, k, v = jnp.split(qkv, [NUM_HEADS, NUM_HEADS + NUM_KV_HEADS], axis=2)
    q = q.transpose(0, 2, 1, 3)
    k = k.transpose(0, 2, 1, 3)
    v = v.transpose(0, 2, 1, 3)

    cos_cache, sin_cache = make_rope_cache(S, HEAD_DIM, ROPE_THETA)
    cos = cos_cache[position_ids][:, None]          # (B, 1, S, hd)
    sin = sin_cache[position_ids][:, None]

    def rot_half(t):
        t1, t2 = jnp.split(t, 2, axis=-1)
        return jnp.concatenate([-t2, t1], axis=-1)

    q = q * cos + rot_half(q) * sin
    k = k * cos + rot_half(k) * sin
    k = jnp.repeat(k, KV_GROUPS, axis=1)            # repeat_kv
    v = jnp.repeat(v, KV_GROUPS, axis=1)

    s = jnp.einsum("bhqd,bhkd->bhqk", q / math.sqrt(HEAD_DIM), k)
    s = s + attention_mask[:, None]
    p = jax.nn.softmax(s.astype(jnp.float32), axis=-1)
    o = jnp.einsum("bhqk,bhkd->bhqd", p, v)
    o = o.transpose(0, 2, 1, 3).reshape(B, S, NUM_HEADS * HEAD_DIM)
    return o @ params["wdense"] + params["bdense"][0]


if __name__ == "__main__":
    key = jax.random.PRNGKey(0)
    k_x, k_p = jax.random.split(key)

    hidden_states = jax.random.normal(k_x, (BSZ, SEQ, HIDDEN), jnp.float32)
    position_ids = jnp.broadcast_to(jnp.arange(SEQ, dtype=jnp.int32), (BSZ, SEQ))
    params = init_params(k_p)

    y = bailing_moe_attention(hidden_states, position_ids, params)
    jax.block_until_ready(y)
    assert y.shape == (BSZ, SEQ, HIDDEN)

    causal = jnp.where(jnp.arange(SEQ)[:, None] >= jnp.arange(SEQ)[None, :],
                       0.0, MASK_VALUE).astype(jnp.float32)
    attention_mask = jnp.broadcast_to(causal, (BSZ, SEQ, SEQ))
    y_ref = ref_forward(hidden_states, position_ids, attention_mask, params)
    # tolerance leaves headroom for the approx-EUP reciprocal in the softmax
    if not jnp.allclose(y, y_ref, atol=2e-3, rtol=2e-3):
        raise AssertionError("Pallas BailingMoeAttention mismatch vs JAX reference")

    print("KERNEL_OK")
</pallas_src>

<mosaic_0001>
module attributes {stable_mosaic.version = 11 : i64} {
  func.func @attention_kernel(%arg0: memref<16x128xf32, #tpu.memory_space<vmem>>, %arg1: memref<16x128xf32, #tpu.memory_space<vmem>>, %arg2: memref<16x128xf32, #tpu.memory_space<vmem>>, %arg3: memref<16x64xf32, #tpu.memory_space<vmem>>, %arg4: memref<16x64xf32, #tpu.memory_space<vmem>>, %arg5: memref<128x448xf32, #tpu.memory_space<vmem>>, %arg6: memref<1x448xf32, #tpu.memory_space<vmem>>, %arg7: memref<128x128xf32, #tpu.memory_space<vmem>>, %arg8: memref<1x128xf32, #tpu.memory_space<vmem>>, %arg9: memref<16x128xf32, #tpu.memory_space<vmem>>, %arg10: memref<16x128xf32, #tpu.memory_space<vmem>>) attributes {dimension_semantics = [], scalar_prefetch = 0 : i64, scratch_operands = 1 : i64, tpu.core_type = #tpu.core_type<tc>} {
    %c0 = arith.constant 0 : index
    %c0_0 = arith.constant 0 : index
    %0 = vector.load %arg0[%c0, %c0_0] : memref<16x128xf32, #tpu.memory_space<vmem>>, vector<16x128xf32>
    %c0_1 = arith.constant 0 : index
    %c0_2 = arith.constant 0 : index
    %1 = vector.load %arg5[%c0_1, %c0_2] : memref<128x448xf32, #tpu.memory_space<vmem>>, vector<128x448xf32>
    %cst = arith.constant dense<0.000000e+00> : vector<16x448xf32>
    %2 = tpu.matmul %0, %1, %cst {dimension_numbers = #tpu.dot_dimension_numbers<[1], [0], [0], [1], [0, 0, 1, 1], [], []>} : vector<16x128xf32>, vector<128x448xf32>, vector<16x448xf32> -> vector<16x448xf32>
    %c0_3 = arith.constant 0 : index
    %c0_4 = arith.constant 0 : index
    %3 = vector.load %arg6[%c0_3, %c0_4] : memref<1x448xf32, #tpu.memory_space<vmem>>, vector<1x448xf32>
    %4 = vector.broadcast %3 : vector<1x448xf32> to vector<16x448xf32>
    %5 = arith.addf %2, %4 : vector<16x448xf32>
    %6 = vector.extract_strided_slice %5 {offsets = [0, 0], sizes = [16, 128], strides = [1, 1]} : vector<16x448xf32> to vector<16x128xf32>
    %c0_5 = arith.constant 0 : index
    %c0_6 = arith.constant 0 : index
    %7 = vector.load %arg1[%c0_5, %c0_6] : memref<16x128xf32, #tpu.memory_space<vmem>>, vector<16x128xf32>
    %8 = arith.mulf %6, %7 : vector<16x128xf32>
    %9 = vector.extract_strided_slice %5 {offsets = [0, 128], sizes = [16, 128], strides = [1, 1]} : vector<16x448xf32> to vector<16x128xf32>
    %c0_7 = arith.constant 0 : index
    %c0_8 = arith.constant 0 : index
    %10 = vector.load %arg2[%c0_7, %c0_8] : memref<16x128xf32, #tpu.memory_space<vmem>>, vector<16x128xf32>
    %11 = arith.mulf %9, %10 : vector<16x128xf32>
    %12 = arith.addf %8, %11 : vector<16x128xf32>
    %13 = vector.extract_strided_slice %5 {offsets = [0, 256], sizes = [16, 64], strides = [1, 1]} : vector<16x448xf32> to vector<16x64xf32>
    %c0_9 = arith.constant 0 : index
    %c0_10 = arith.constant 0 : index
    %14 = vector.load %arg3[%c0_9, %c0_10] : memref<16x64xf32, #tpu.memory_space<vmem>>, vector<16x64xf32>
    %15 = arith.mulf %13, %14 : vector<16x64xf32>
    %16 = vector.extract_strided_slice %5 {offsets = [0, 320], sizes = [16, 64], strides = [1, 1]} : vector<16x448xf32> to vector<16x64xf32>
    %c0_11 = arith.constant 0 : index
    %c0_12 = arith.constant 0 : index
    %17 = vector.load %arg4[%c0_11, %c0_12] : memref<16x64xf32, #tpu.memory_space<vmem>>, vector<16x64xf32>
    %18 = arith.mulf %16, %17 : vector<16x64xf32>
    %19 = arith.addf %15, %18 : vector<16x64xf32>
    %20 = vector.extract_strided_slice %5 {offsets = [0, 384], sizes = [16, 64], strides = [1, 1]} : vector<16x448xf32> to vector<16x64xf32>
    %21 = tpu.iota {dimensions = array<i32: 0>} : vector<8x8xi32>
    %22 = tpu.iota {dimensions = array<i32: 1>} : vector<8x8xi32>
    %23 = arith.cmpi sge, %21, %22 : vector<8x8xi32>
    %cst_13 = arith.constant 0.000000e+00 : f32
    %cst_14 = arith.constant -1.000000e+09 : f32
    %24 = vector.broadcast %cst_13 : f32 to vector<8x8xf32>
    %25 = vector.broadcast %cst_14 : f32 to vector<8x8xf32>
    %26 = arith.select %23, %24, %25 : vector<8x8xi1>, vector<8x8xf32>
    %27 = tpu.concatenate %26, %26 in 0 : vector<8x8xf32>, vector<8x8xf32> -> vector<16x8xf32>
    %28 = vector.extract_strided_slice %12 {offsets = [0, 0], sizes = [8, 32], strides = [1, 1]} : vector<16x128xf32> to vector<8x32xf32>
    %29 = vector.extract_strided_slice %12 {offsets = [0, 32], sizes = [8, 32], strides = [1, 1]} : vector<16x128xf32> to vector<8x32xf32>
    %30 = tpu.concatenate %28, %29 in 0 : vector<8x32xf32>, vector<8x32xf32> -> vector<16x32xf32>
    %31 = vector.extract_strided_slice %19 {offsets = [0, 0], sizes = [8, 32], strides = [1, 1]} : vector<16x64xf32> to vector<8x32xf32>
    %32 = vector.extract_strided_slice %20 {offsets = [0, 0], sizes = [8, 32], strides = [1, 1]} : vector<16x64xf32> to vector<8x32xf32>
    %cst_15 = arith.constant dense<0.000000e+00> : vector<16x8xf32>
    %33 = tpu.matmul %30, %31, %cst_15 {dimension_numbers = #tpu.dot_dimension_numbers<[1], [1], [0], [0], [0, 0, 1, 0], [], []>} : vector<16x32xf32>, vector<8x32xf32>, vector<16x8xf32> -> vector<16x8xf32>
    %34 = arith.addf %33, %27 : vector<16x8xf32>
    %cst_16 = arith.constant dense<0xFF800000> : vector<16xf32>
    %35 = vector.multi_reduction <maximumf>, %34, %cst_16 [1] : vector<16x8xf32> to vector<16xf32>
    %36 = vector.shape_cast %35 : vector<16xf32> to vector<16x1xf32>
    %37 = vector.broadcast %36 : vector<16x1xf32> to vector<16x8xf32>
    %38 = arith.subf %34, %37 : vector<16x8xf32>
    %39 = math.exp %38 : vector<16x8xf32>
    %cst_17 = arith.constant dense<0.000000e+00> : vector<16xf32>
    %40 = vector.multi_reduction <add>, %39, %cst_17 [1] : vector<16x8xf32> to vector<16xf32>
    %41 = vector.shape_cast %40 : vector<16xf32> to vector<16x1xf32>
    %42 = tpu.reciprocal %41 {approx = true} : vector<16x1xf32> -> vector<16x1xf32>
    %43 = vector.broadcast %42 : vector<16x1xf32> to vector<16x8xf32>
    %44 = arith.mulf %39, %43 : vector<16x8xf32>
    %cst_18 = arith.constant dense<0.000000e+00> : vector<16x32xf32>
    %45 = tpu.matmul %44, %32, %cst_18 {dimension_numbers = #tpu.dot_dimension_numbers<[1], [0], [0], [1], [0, 0, 1, 1], [], []>} : vector<16x8xf32>, vector<8x32xf32>, vector<16x32xf32> -> vector<16x32xf32>
    %46 = vector.extract_strided_slice %45 {offsets = [0, 0], sizes = [8, 32], strides = [1, 1]} : vector<16x32xf32> to vector<8x32xf32>
    %c0_19 = arith.constant 0 : index
    %c0_20 = arith.constant 0 : index
    %47 = vector.load %arg10[%c0_19, %c0_20] : memref<16x128xf32, #tpu.memory_space<vmem>>, vector<8x32xf32>
    tpu.vector_store %arg10[%c0_19, %c0_20], %46 {strides = array<i32>} : memref<16x128xf32, #tpu.memory_space<vmem>>, vector<8x32xf32>,
    %48 = vector.extract_strided_slice %45 {offsets = [8, 0], sizes = [8, 32], strides = [1, 1]} : vector<16x32xf32> to vector<8x32xf32>
    %c0_21 = arith.constant 0 : index
    %c32 = arith.constant 32 : index
    %49 = vector.load %arg10[%c0_21, %c32] : memref<16x128xf32, #tpu.memory_space<vmem>>, vector<8x32xf32>
    tpu.vector_store %arg10[%c0_21, %c32], %48 {strides = array<i32>} : memref<16x128xf32, #tpu.memory_space<vmem>>, vector<8x32xf32>,
    %50 = vector.extract_strided_slice %12 {offsets = [0, 64], sizes = [8, 32], strides = [1, 1]} : vector<16x128xf32> to vector<8x32xf32>
    %51 = vector.extract_strided_slice %12 {offsets = [0, 96], sizes = [8, 32], strides = [1, 1]} : vector<16x128xf32> to vector<8x32xf32>
    %52 = tpu.concatenate %50, %51 in 0 : vector<8x32xf32>, vector<8x32xf32> -> vector<16x32xf32>
    %53 = vector.extract_strided_slice %19 {offsets = [0, 32], sizes = [8, 32], strides = [1, 1]} : vector<16x64xf32> to vector<8x32xf32>
    %54 = vector.extract_strided_slice %20 {offsets = [0, 32], sizes = [8, 32], strides = [1, 1]} : vector<16x64xf32> to vector<8x32xf32>
    %cst_22 = arith.constant dense<0.000000e+00> : vector<16x8xf32>
    %55 = tpu.matmul %52, %53, %cst_22 {dimension_numbers = #tpu.dot_dimension_numbers<[1], [1], [0], [0], [0, 0, 1, 0], [], []>} : vector<16x32xf32>, vector<8x32xf32>, vector<16x8xf32> -> vector<16x8xf32>
    %56 = arith.addf %55, %27 : vector<16x8xf32>
    %cst_23 = arith.constant dense<0xFF800000> : vector<16xf32>
    %57 = vector.multi_reduction <maximumf>, %56, %cst_23 [1] : vector<16x8xf32> to vector<16xf32>
    %58 = vector.shape_cast %57 : vector<16xf32> to vector<16x1xf32>
    %59 = vector.broadcast %58 : vector<16x1xf32> to vector<16x8xf32>
    %60 = arith.subf %56, %59 : vector<16x8xf32>
    %61 = math.exp %60 : vector<16x8xf32>
    %cst_24 = arith.constant dense<0.000000e+00> : vector<16xf32>
    %62 = vector.multi_reduction <add>, %61, %cst_24 [1] : vector<16x8xf32> to vector<16xf32>
    %63 = vector.shape_cast %62 : vector<16xf32> to vector<16x1xf32>
    %64 = tpu.reciprocal %63 {approx = true} : vector<16x1xf32> -> vector<16x1xf32>
    %65 = vector.broadcast %64 : vector<16x1xf32> to vector<16x8xf32>
    %66 = arith.mulf %61, %65 : vector<16x8xf32>
    %cst_25 = arith.constant dense<0.000000e+00> : vector<16x32xf32>
    %67 = tpu.matmul %66, %54, %cst_25 {dimension_numbers = #tpu.dot_dimension_numbers<[1], [0], [0], [1], [0, 0, 1, 1], [], []>} : vector<16x8xf32>, vector<8x32xf32>, vector<16x32xf32> -> vector<16x32xf32>
    %68 = vector.extract_strided_slice %67 {offsets = [0, 0], sizes = [8, 32], strides = [1, 1]} : vector<16x32xf32> to vector<8x32xf32>
    %c0_26 = arith.constant 0 : index
    %c64 = arith.constant 64 : index
    %69 = vector.load %arg10[%c0_26, %c64] : memref<16x128xf32, #tpu.memory_space<vmem>>, vector<8x32xf32>
    tpu.vector_store %arg10[%c0_26, %c64], %68 {strides = array<i32>} : memref<16x128xf32, #tpu.memory_space<vmem>>, vector<8x32xf32>,
    %70 = vector.extract_strided_slice %67 {offsets = [8, 0], sizes = [8, 32], strides = [1, 1]} : vector<16x32xf32> to vector<8x32xf32>
    %c0_27 = arith.constant 0 : index
    %c96 = arith.constant 96 : index
    %71 = vector.load %arg10[%c0_27, %c96] : memref<16x128xf32, #tpu.memory_space<vmem>>, vector<8x32xf32>
    tpu.vector_store %arg10[%c0_27, %c96], %70 {strides = array<i32>} : memref<16x128xf32, #tpu.memory_space<vmem>>, vector<8x32xf32>,
    %72 = vector.extract_strided_slice %12 {offsets = [8, 0], sizes = [8, 32], strides = [1, 1]} : vector<16x128xf32> to vector<8x32xf32>
    %73 = vector.extract_strided_slice %12 {offsets = [8, 32], sizes = [8, 32], strides = [1, 1]} : vector<16x128xf32> to vector<8x32xf32>
    %74 = tpu.concatenate %72, %73 in 0 : vector<8x32xf32>, vector<8x32xf32> -> vector<16x32xf32>
    %75 = vector.extract_strided_slice %19 {offsets = [8, 0], sizes = [8, 32], strides = [1, 1]} : vector<16x64xf32> to vector<8x32xf32>
    %76 = vector.extract_strided_slice %20 {offsets = [8, 0], sizes = [8, 32], strides = [1, 1]} : vector<16x64xf32> to vector<8x32xf32>
    %cst_28 = arith.constant dense<0.000000e+00> : vector<16x8xf32>
    %77 = tpu.matmul %74, %75, %cst_28 {dimension_numbers = #tpu.dot_dimension_numbers<[1], [1], [0], [0], [0, 0, 1, 0], [], []>} : vector<16x32xf32>, vector<8x32xf32>, vector<16x8xf32> -> vector<16x8xf32>
    %78 = arith.addf %77, %27 : vector<16x8xf32>
    %cst_29 = arith.constant dense<0xFF800000> : vector<16xf32>
    %79 = vector.multi_reduction <maximumf>, %78, %cst_29 [1] : vector<16x8xf32> to vector<16xf32>
    %80 = vector.shape_cast %79 : vector<16xf32> to vector<16x1xf32>
    %81 = vector.broadcast %80 : vector<16x1xf32> to vector<16x8xf32>
    %82 = arith.subf %78, %81 : vector<16x8xf32>
    %83 = math.exp %82 : vector<16x8xf32>
    %cst_30 = arith.constant dense<0.000000e+00> : vector<16xf32>
    %84 = vector.multi_reduction <add>, %83, %cst_30 [1] : vector<16x8xf32> to vector<16xf32>
    %85 = vector.shape_cast %84 : vector<16xf32> to vector<16x1xf32>
    %86 = tpu.reciprocal %85 {approx = true} : vector<16x1xf32> -> vector<16x1xf32>
    %87 = vector.broadcast %86 : vector<16x1xf32> to vector<16x8xf32>
    %88 = arith.mulf %83, %87 : vector<16x8xf32>
    %cst_31 = arith.constant dense<0.000000e+00> : vector<16x32xf32>
    %89 = tpu.matmul %88, %76, %cst_31 {dimension_numbers = #tpu.dot_dimension_numbers<[1], [0], [0], [1], [0, 0, 1, 1], [], []>} : vector<16x8xf32>, vector<8x32xf32>, vector<16x32xf32> -> vector<16x32xf32>
    %90 = vector.extract_strided_slice %89 {offsets = [0, 0], sizes = [8, 32], strides = [1, 1]} : vector<16x32xf32> to vector<8x32xf32>
    %c8 = arith.constant 8 : index
    %c0_32 = arith.constant 0 : index
    %91 = vector.load %arg10[%c8, %c0_32] : memref<16x128xf32, #tpu.memory_space<vmem>>, vector<8x32xf32>
    tpu.vector_store %arg10[%c8, %c0_32], %90 {strides = array<i32>} : memref<16x128xf32, #tpu.memory_space<vmem>>, vector<8x32xf32>,
    %92 = vector.extract_strided_slice %89 {offsets = [8, 0], sizes = [8, 32], strides = [1, 1]} : vector<16x32xf32> to vector<8x32xf32>
    %c8_33 = arith.constant 8 : index
    %c32_34 = arith.constant 32 : index
    %93 = vector.load %arg10[%c8_33, %c32_34] : memref<16x128xf32, #tpu.memory_space<vmem>>, vector<8x32xf32>
    tpu.vector_store %arg10[%c8_33, %c32_34], %92 {strides = array<i32>} : memref<16x128xf32, #tpu.memory_space<vmem>>, vector<8x32xf32>,
    %94 = vector.extract_strided_slice %12 {offsets = [8, 64], sizes = [8, 32], strides = [1, 1]} : vector<16x128xf32> to vector<8x32xf32>
    %95 = vector.extract_strided_slice %12 {offsets = [8, 96], sizes = [8, 32], strides = [1, 1]} : vector<16x128xf32> to vector<8x32xf32>
    %96 = tpu.concatenate %94, %95 in 0 : vector<8x32xf32>, vector<8x32xf32> -> vector<16x32xf32>
    %97 = vector.extract_strided_slice %19 {offsets = [8, 32], sizes = [8, 32], strides = [1, 1]} : vector<16x64xf32> to vector<8x32xf32>
    %98 = vector.extract_strided_slice %20 {offsets = [8, 32], sizes = [8, 32], strides = [1, 1]} : vector<16x64xf32> to vector<8x32xf32>
    %cst_35 = arith.constant dense<0.000000e+00> : vector<16x8xf32>
    %99 = tpu.matmul %96, %97, %cst_35 {dimension_numbers = #tpu.dot_dimension_numbers<[1], [1], [0], [0], [0, 0, 1, 0], [], []>} : vector<16x32xf32>, vector<8x32xf32>, vector<16x8xf32> -> vector<16x8xf32>
    %100 = arith.addf %99, %27 : vector<16x8xf32>
    %cst_36 = arith.constant dense<0xFF800000> : vector<16xf32>
    %101 = vector.multi_reduction <maximumf>, %100, %cst_36 [1] : vector<16x8xf32> to vector<16xf32>
    %102 = vector.shape_cast %101 : vector<16xf32> to vector<16x1xf32>
    %103 = vector.broadcast %102 : vector<16x1xf32> to vector<16x8xf32>
    %104 = arith.subf %100, %103 : vector<16x8xf32>
    %105 = math.exp %104 : vector<16x8xf32>
    %cst_37 = arith.constant dense<0.000000e+00> : vector<16xf32>
    %106 = vector.multi_reduction <add>, %105, %cst_37 [1] : vector<16x8xf32> to vector<16xf32>
    %107 = vector.shape_cast %106 : vector<16xf32> to vector<16x1xf32>
    %108 = tpu.reciprocal %107 {approx = true} : vector<16x1xf32> -> vector<16x1xf32>
    %109 = vector.broadcast %108 : vector<16x1xf32> to vector<16x8xf32>
    %110 = arith.mulf %105, %109 : vector<16x8xf32>
    %cst_38 = arith.constant dense<0.000000e+00> : vector<16x32xf32>
    %111 = tpu.matmul %110, %98, %cst_38 {dimension_numbers = #tpu.dot_dimension_numbers<[1], [0], [0], [1], [0, 0, 1, 1], [], []>} : vector<16x8xf32>, vector<8x32xf32>, vector<16x32xf32> -> vector<16x32xf32>
    %112 = vector.extract_strided_slice %111 {offsets = [0, 0], sizes = [8, 32], strides = [1, 1]} : vector<16x32xf32> to vector<8x32xf32>
    %c8_39 = arith.constant 8 : index
    %c64_40 = arith.constant 64 : index
    %113 = vector.load %arg10[%c8_39, %c64_40] : memref<16x128xf32, #tpu.memory_space<vmem>>, vector<8x32xf32>
    tpu.vector_store %arg10[%c8_39, %c64_40], %112 {strides = array<i32>} : memref<16x128xf32, #tpu.memory_space<vmem>>, vector<8x32xf32>,
    %114 = vector.extract_strided_slice %111 {offsets = [8, 0], sizes = [8, 32], strides = [1, 1]} : vector<16x32xf32> to vector<8x32xf32>
    %c8_41 = arith.constant 8 : index
    %c96_42 = arith.constant 96 : index
    %115 = vector.load %arg10[%c8_41, %c96_42] : memref<16x128xf32, #tpu.memory_space<vmem>>, vector<8x32xf32>
    tpu.vector_store %arg10[%c8_41, %c96_42], %114 {strides = array<i32>} : memref<16x128xf32, #tpu.memory_space<vmem>>, vector<8x32xf32>,
    %c0_43 = arith.constant 0 : index
    %c0_44 = arith.constant 0 : index
    %116 = vector.load %arg10[%c0_43, %c0_44] : memref<16x128xf32, #tpu.memory_space<vmem>>, vector<16x128xf32>
    %c0_45 = arith.constant 0 : index
    %c0_46 = arith.constant 0 : index
    %117 = vector.load %arg7[%c0_45, %c0_46] : memref<128x128xf32, #tpu.memory_space<vmem>>, vector<128x128xf32>
    %cst_47 = arith.constant dense<0.000000e+00> : vector<16x128xf32>
    %118 = tpu.matmul %116, %117, %cst_47 {dimension_numbers = #tpu.dot_dimension_numbers<[1], [0], [0], [1], [0, 0, 1, 1], [], []>} : vector<16x128xf32>, vector<128x128xf32>, vector<16x128xf32> -> vector<16x128xf32>
    %c0_48 = arith.constant 0 : index
    %c0_49 = arith.constant 0 : index
    %119 = vector.load %arg8[%c0_48, %c0_49] : memref<1x128xf32, #tpu.memory_space<vmem>>, vector<1x128xf32>
    %120 = vector.broadcast %119 : vector<1x128xf32> to vector<16x128xf32>
    %121 = arith.addf %118, %120 : vector<16x128xf32>
    %c0_50 = arith.constant 0 : index
    %c0_51 = arith.constant 0 : index
    %122 = vector.load %arg9[%c0_50, %c0_51] : memref<16x128xf32, #tpu.memory_space<vmem>>, vector<16x128xf32>
    tpu.vector_store %arg9[%c0_50, %c0_51], %121 {strides = array<i32>} : memref<16x128xf32, #tpu.memory_space<vmem>>, vector<16x128xf32>,
    return
  }
}

</mosaic_0001>

<bundles_post_ra>
// kernel: tile.27
= control target key start
LH: loop header
LB: loop body
LE: loop exit
PB: predicated region body
PF: predicated region fallthrough
CT: control target
= control target key end

     0   :  { %vm82_vm0 = vcmask 1047556   ;;  %vm84_vm1 = vcmask 261120   ;;  %vm103_vm2 = vcmask 523520   ;;  %s225_s0 = inlined_call_operand.vmem [shape: f32[16,2,32], index: 0, kind: input, shape index: {}]   ;;  %s226_s1 = inlined_call_operand.vmem [shape: f32[16,64], index: 1, kind: output, shape index: {}]  }
   0x1   :  { %v138_v0 = vld [vmem:[%s225_s0 + $0xe] sm:$0x3]  ;;  %v139_v1 = vld [vmem:[%s225_s0 + $0xc] sm:$0x3]  ;;  %v140_v2 = vld [vmem:[%s225_s0 + $0xa] sm:$0x3] }
   0x2   :  { %48 = vst [vmem:[#allocation0 + $0x38] sm:$0x3] %v138_v0  ;;  %53 = vst [vmem:[#allocation0 + $0x30] sm:$0x3] %v139_v1  ;;  %v141_v3 = vld [vmem:[%s225_s0 + $0x8] sm:$0x3] }
   0x3   :  { %58 = vst [vmem:[#allocation0 + $0x28] sm:$0x3] %v140_v2  ;;  %v142_v4 = vld [vmem:[%s225_s0 + $0x6] sm:$0x3]  ;;  %v143_v5 = vld [vmem:[%s225_s0 + $0x4] sm:$0x3] }
   0x4   :  { %63 = vst [vmem:[#allocation0 + $0x20] sm:$0x3] %v141_v3  ;;  %68 = vst [vmem:[#allocation0 + $0x18] sm:$0x3] %v142_v4  ;;  %v144_v6 = vld [vmem:[%s225_s0 + $0x2] sm:$0x3] }
   0x5   :  { %73 = vst [vmem:[#allocation0 + $0x10] sm:$0x3] %v143_v5  ;;  %v78_v7 = vld [vmem:[%s225_s0] sm:$0x3]  ;;  %77 = vst [vmem:[#allocation0 + $0x8] sm:$0x3] %v144_v6 }
   0x6   :  { %79 = vst [vmem:[#allocation0] sm:$0x3] %v78_v7  ;;  %v130_v8 = vld [vmem:[%s225_s0 + $0x1e] sm:$0x3]  ;;  %v131_v9 = vld [vmem:[%s225_s0 + $0x1c] sm:$0x3] }
   0x7   :  { %v132_v10 = vld [vmem:[%s225_s0 + $0x1a] sm:$0x3]  ;;  %8 = vst [vmem:[#allocation0 + $0x78] sm:$0x3] %v130_v8  ;;  %13 = vst [vmem:[#allocation0 + $0x70] sm:$0x3] %v131_v9 }
   0x8   :  { %18 = vst [vmem:[#allocation0 + $0x68] sm:$0x3] %v132_v10  ;;  %v133_v11 = vld [vmem:[%s225_s0 + $0x18] sm:$0x3]  ;;  %v134_v12 = vld [vmem:[%s225_s0 + $0x16] sm:$0x3] }
   0x9   :  { %v135_v13 = vld [vmem:[%s225_s0 + $0x14] sm:$0x3]  ;;  %23 = vst [vmem:[#allocation0 + $0x60] sm:$0x3] %v133_v11  ;;  %28 = vst [vmem:[#allocation0 + $0x58] sm:$0x3] %v134_v12 }
   0xa   :  { %33 = vst [vmem:[#allocation0 + $0x50] sm:$0x3] %v135_v13  ;;  %v136_v14 = vld [vmem:[%s225_s0 + $0x12] sm:$0x3]  ;;  %v137_v15 = vld [vmem:[%s225_s0 + $0x10] sm:$0x3] }
   0xb   :  { %38 = vst [vmem:[#allocation0 + $0x48] sm:$0x3] %v136_v14  ;;  %43 = vst [vmem:[#allocation0 + $0x40] sm:$0x3] %v137_v15  ;;  %s148_s0 = smov 32  }
   0xc   :  { %v98_v16 = vld [vmem:[#allocation0 + $0x1] ss:$8 sm:$0xf0]   ;;  %v81_v17 = vld [vmem:[#allocation0] ss:$8 sm:$0xf0]  }
   0xd   :  { %v96_v18 = vld [vmem:[#allocation0 + $0x1] ss:$8 sm:$0xf]   ;;  %v80_v19 = vld [vmem:[#allocation0] ss:$8 sm:$0xf]  }
   0xe   :  { %v100_v20 = vsel %vm82_vm0, %v98_v16, %v96_v18  ;;  %v83_v21 = vsel %vm82_vm0, %v81_v17, %v80_v19 }
   0xf   :  { %101 = vrot.lane.b32.xlu0 %v100_v20, %s148_s0  ;;  %85 = vst.msk [vmem:[%s226_s1] sm:$0xff] %vm84_vm1, %v83_v21  }
  0x10   :  { %v108_v22 = vld [vmem:[#allocation0 + $0x41] ss:$8 sm:$0xf0]   ;;  %v89_v23 = vld [vmem:[#allocation0 + $0x40] ss:$8 sm:$0xf0]  }
  0x12   :  { %v106_v24 = vld [vmem:[#allocation0 + $0x41] ss:$8 sm:$0xf]   ;;  %v87_v25 = vld [vmem:[#allocation0 + $0x40] ss:$8 sm:$0xf]  }
  0x13   :  { %v110_v26 = vsel %vm82_vm0, %v108_v22, %v106_v24  ;;  %v91_v27 = vsel %vm82_vm0, %v89_v23, %v87_v25 }
  0x14   :  { %145 = vst.msk [vmem:[%s226_s1 + $0x8] sm:$0xff] %vm84_vm1, %v91_v27   ;;  %111 = vrot.lane.b32.xlu0 %v110_v26, %s148_s0 }
  0x81   :  { %v102_v28 = vpop.permute.xlu0 %101  }
  0x82   :  { %104 = vst.msk [vmem:[%s226_s1] sm:$0xff] %vm103_vm2, %v102_v28  }
  0x86   :  { %v112_v29 = vpop.permute.xlu0 %111  }
  0x87   :  { %146 = vst.msk [vmem:[%s226_s1 + $0x8] sm:$0xff] %vm103_vm2, %v112_v29  }

// kernel: bailing_moe_attention.1
= control target key start
LH: loop header
LB: loop body
LE: loop exit
PB: predicated region body
PF: predicated region fallthrough
CT: control target
= control target key end

     0   :  { %v1534_v7 = vmov 0.0   ;;  %s1535_s22 = smov 64   ;;  %s2004_s0 = inlined_call_operand.vmem [shape: f32[16,128], index: 0, kind: input, shape index: {}]   ;;  %s2005_s1 = inlined_call_operand.vmem [shape: f32[16,128], index: 1, kind: input, shape index: {}]   ;;  %s2006_s2 = inlined_call_operand.vmem [shape: f32[16,128], index: 2, kind: input, shape index: {}]   ;;  %s2007_s3 = inlined_call_operand.vmem [shape: f32[16,64], index: 3, kind: input, shape index: {}]   ;;  %s2008_s4 = inlined_call_operand.vmem [shape: f32[16,64], index: 4, kind: input, shape index: {}]   ;;  %s2009_s5 = inlined_call_operand.vmem [shape: f32[128,448], index: 5, kind: input, shape index: {}]   ;;  %s2010_s6 = inlined_call_operand.vmem [shape: f32[1,448], index: 6, kind: input, shape index: {}]   ;;  %s2011_s7 = inlined_call_operand.vmem [shape: f32[128,128], index: 7, kind: input, shape index: {}]   ;;  %s2012_s8 = inlined_call_operand.vmem [shape: f32[1,128], index: 8, kind: input, shape index: {}]   ;;  %s2013_s9 = inlined_call_operand.hbm [shape: f32[16,128], index: 9, kind: output, shape index: {}]  }
   0x1   :  { %v38_v0 = vld [vmem:[%s2009_s5 + $0x18] sm:$0xff]  ;;  %v37_v2 = vld [vmem:[%s2009_s5 + $0x10] sm:$0xff]  ;;  %v36_v5 = vld [vmem:[%s2009_s5 + $0x8] sm:$0xff]  ;;  %262 = vmatprep.mubr.f32.mxu1 %v1534_v7  ;;  %185 = vmatprep.mubr.f32.mxu0 %v1534_v7 }
   0x2   :  { %v42_v1 = vld [vmem:[%s2009_s5 + $0x38] sm:$0xff]  ;;  %v41_v4 = vld [vmem:[%s2009_s5 + $0x30] sm:$0xff]  ;;  %v40_v6 = vld [vmem:[%s2009_s5 + $0x28] sm:$0xff] }
   0x3   :  { %v1406_v3 = vpack.c.bf16 %v42_v1, %v38_v0  ;;  %v1408_v8 = vpack.c.bf16 %v41_v4, %v37_v2  ;;  %v1374_v9 = vpack.c.bf16 %v40_v6, %v36_v5  ;;  %v35_v10 = vld [vmem:[%s2009_s5] sm:$0xff]  ;;  %v46_v12 = vld [vmem:[%s2009_s5 + $0x58] sm:$0xff]  ;;  %v45_v15 = vld [vmem:[%s2009_s5 + $0x50] sm:$0xff] }
   0x4   :  { %v39_v11 = vld [vmem:[%s2009_s5 + $0x20] sm:$0xff]  ;;  %v50_v14 = vld [vmem:[%s2009_s5 + $0x78] sm:$0xff]  ;;  %v49_v16 = vld [vmem:[%s2009_s5 + $0x70] sm:$0xff] }
   0x5   :  { %1407 = vmatprep.subr.bf16.mxu1 %v1406_v3  ;;  %v1376_v13 = vpack.c.bf16 %v39_v11, %v35_v10  ;;  %1375 = vmatprep.subr.bf16.mxu0 %v1374_v9  ;;  %v1410_v17 = vpack.c.bf16 %v50_v14, %v46_v12  ;;  %v1412_v18 = vpack.c.bf16 %v49_v16, %v45_v15  ;;  %v44_v19 = vld [vmem:[%s2009_s5 + $0x48] sm:$0xff]  ;;  %v43_v21 = vld [vmem:[%s2009_s5 + $0x40] sm:$0xff]  ;;  %v54_v24 = vld [vmem:[%s2009_s5 + $0x98] sm:$0xff] }
   0x6   :  { %1409 = vmatpush1.bf16.msra.mxu1 %v1408_v8  ;;  %v48_v20 = vld [vmem:[%s2009_s5 + $0x68] sm:$0xff]  ;;  %v47_v23 = vld [vmem:[%s2009_s5 + $0x60] sm:$0xff]  ;;  %v58_v25 = vld [vmem:[%s2009_s5 + $0xb8] sm:$0xff] }
   0x7   :  { %1377 = vmatpush1.bf16.msra.mxu0 %v1376_v13  ;;  %v1378_v22 = vpack.c.bf16 %v48_v20, %v44_v19  ;;  %1411 = vmatprep.subr.bf16.mxu1 %v1410_v17  ;;  %v1380_v26 = vpack.c.bf16 %v47_v23, %v43_v21  ;;  %v1414_v27 = vpack.c.bf16 %v58_v25, %v54_v24  ;;  %v53_v28 = vld [vmem:[%s2009_s5 + $0x90] sm:$0xff]  ;;  %v52_v30 = vld [vmem:[%s2009_s5 + $0x88] sm:$0xff]  ;;  %v51_v32 = vld [vmem:[%s2009_s5 + $0x80] sm:$0xff] }
   0x8   :  { %v57_v29 = vld [vmem:[%s2009_s5 + $0xb0] sm:$0xff]  ;;  %v56_v31 = vld [vmem:[%s2009_s5 + $0xa8] sm:$0xff]  ;;  %v55_v33 = vld [vmem:[%s2009_s5 + $0xa0] sm:$0xff] }
   0x9   :  { %1379 = vmatprep.subr.bf16.mxu0 %v1378_v22  ;;  %v1416_v34 = vpack.c.bf16 %v57_v29, %v53_v28  ;;  %v1382_v35 = vpack.c.bf16 %v56_v31, %v52_v30  ;;  %v62_v36 = vld [vmem:[%s2009_s5 + $0xd8] sm:$0xff]  ;;  %v61_v38 = vld [vmem:[%s2009_s5 + $0xd0] sm:$0xff]  ;;  %v1384_v39 = vpack.c.bf16 %v55_v33, %v51_v32  ;;  %v60_v42 = vld [vmem:[%s2009_s5 + $0xc8] sm:$0xff] }
   0xa   :  { %1413 = vmatpush1.bf16.msra.mxu1 %v1412_v18  ;;  %v66_v37 = vld [vmem:[%s2009_s5 + $0xf8] sm:$0xff]  ;;  %v65_v41 = vld [vmem:[%s2009_s5 + $0xf0] sm:$0xff]  ;;  %v64_v43 = vld [vmem:[%s2009_s5 + $0xe8] sm:$0xff] }
   0xb   :  { %1381 = vmatpush1.bf16.msra.mxu0 %v1380_v26  ;;  %1415 = vmatprep.subr.bf16.mxu1 %v1414_v27  ;;  %v1418_v40 = vpack.c.bf16 %v66_v37, %v62_v36  ;;  %v1386_v44 = vpack.c.bf16 %v64_v43, %v60_v42  ;;  %v59_v45 = vld [vmem:[%s2009_s5 + $0xc0] sm:$0xff]  ;;  %v70_v47 = vld [vmem:[%s2009_s5 + $0x118] sm:$0xff]  ;;  %v1420_v49 = vpack.c.bf16 %v65_v41, %v61_v38  ;;  %v68_v50 = vld [vmem:[%s2009_s5 + $0x108] sm:$0xff] }
   0xc   :  { %1383 = vmatprep.subr.bf16.mxu0 %v1382_v35  ;;  %v63_v46 = vld [vmem:[%s2009_s5 + $0xe0] sm:$0xff]  ;;  %v74_v48 = vld [vmem:[%s2009_s5 + $0x138] sm:$0xff]  ;;  %v72_v51 = vld [vmem:[%s2009_s5 + $0x128] sm:$0xff] }
   0xd   :  { %v1388_v52 = vpack.c.bf16 %v63_v46, %v59_v45  ;;  %v1422_v53 = vpack.c.bf16 %v74_v48, %v70_v47  ;;  %v69_v54 = vld [vmem:[%s2009_s5 + $0x110] sm:$0xff]  ;;  %v67_v56 = vld [vmem:[%s2009_s5 + $0x100] sm:$0xff]  ;;  %v1390_v57 = vpack.c.bf16 %v72_v51, %v68_v50  ;;  %v78_v59 = vld [vmem:[%s2009_s5 + $0x158] sm:$0xff] }
   0xe   :  { %1417 = vmatpush1.bf16.msra.mxu1 %v1416_v34  ;;  %v73_v55 = vld [vmem:[%s2009_s5 + $0x130] sm:$0xff]  ;;  %v71_v58 = vld [vmem:[%s2009_s5 + $0x120] sm:$0xff]  ;;  %v82_v60 = vld [vmem:[%s2009_s5 + $0x178] sm:$0xff] }
   0xf   :  { %1385 = vmatpush1.bf16.msra.mxu0 %v1384_v39  ;;  %1419 = vmatprep.subr.bf16.mxu1 %v1418_v40  ;;  %v76_v61 = vld [vmem:[%s2009_s5 + $0x148] sm:$0xff]  ;;  %v1424_v63 = vpack.c.bf16 %v73_v55, %v69_v54  ;;  %v1392_v0 = vpack.c.bf16 %v71_v58, %v67_v56  ;;  %v1426_v1 = vpack.c.bf16 %v82_v60, %v78_v59  ;;  %v77_v2 = vld [vmem:[%s2009_s5 + $0x150] sm:$0xff]  ;;  %v75_v4 = vld [vmem:[%s2009_s5 + $0x140] sm:$0xff] }
  0x10   :  { %1387 = vmatprep.subr.bf16.mxu0 %v1386_v44  ;;  %v80_v62 = vld [vmem:[%s2009_s5 + $0x168] sm:$0xff]  ;;  %v81_v3 = vld [vmem:[%s2009_s5 + $0x170] sm:$0xff]  ;;  %v79_v6 = vld [vmem:[%s2009_s5 + $0x160] sm:$0xff] }
  0x11   :  { %v1394_v5 = vpack.c.bf16 %v80_v62, %v76_v61  ;;  %v86_v8 = vld [vmem:[%s2009_s5 + $0x198] sm:$0xff]  ;;  %v84_v10 = vld [vmem:[%s2009_s5 + $0x188] sm:$0xff]  ;;  %v1428_v12 = vpack.c.bf16 %v81_v3, %v77_v2  ;;  %v85_v13 = vld [vmem:[%s2009_s5 + $0x190] sm:$0xff]  ;;  %v1396_v15 = vpack.c.bf16 %v79_v6, %v75_v4 }
  0x12   :  { %1421 = vmatpush1.bf16.msra.mxu1 %v1420_v49  ;;  %v90_v9 = vld [vmem:[%s2009_s5 + $0x1b8] sm:$0xff]  ;;  %v88_v11 = vld [vmem:[%s2009_s5 + $0x1a8] sm:$0xff]  ;;  %v89_v14 = vld [vmem:[%s2009_s5 + $0x1b0] sm:$0xff] }
  0x13   :  { %1389 = vmatpush1.bf16.msra.mxu0 %v1388_v52  ;;  %1423 = vmatprep.subr.bf16.mxu1 %v1422_v53  ;;  %v1430_v16 = vpack.c.bf16 %v90_v9, %v86_v8  ;;  %v83_v17 = vld [vmem:[%s2009_s5 + $0x180] sm:$0xff]  ;;  %v1398_v20 = vpack.c.bf16 %v88_v11, %v84_v10  ;;  %v94_v21 = vld [vmem:[%s2009_s5 + $0x1d8] sm:$0xff] }
  0x14   :  { %1391 = vmatprep.subr.bf16.mxu0 %v1390_v57  ;;  %v87_v18 = vld [vmem:[%s2009_s5 + $0x1a0] sm:$0xff]  ;;  %v98_v22 = vld [vmem:[%s2009_s5 + $0x1f8] sm:$0xff] }
  0x15   :  { %v289_v19 = vld [vmem:[%s2008_s4] sm:$0xff] }
  0x16   :  { %1425 = vmatpush1.bf16.msra.mxu1 %v1424_v63  ;;  %293 = vrot.lane.b32.xlu0 %v289_v19, %s1535_s22 }
  0x17   :  { %1393 = vmatpush1.bf16.msra.mxu0 %v1392_v0  ;;  %1427 = vmatprep.subr.bf16.mxu1 %v1426_v1 }
  0x18   :  { %1395 = vmatprep.subr.bf16.mxu0 %v1394_v5 }
  0x19   :  { %14 = vsyncpa [#allocation4], 0  ;;  %v92_v23 = vld [vmem:[%s2009_s5 + $0x1c8] sm:$0xff]  ;;  %v1432_v25 = vpack.c.bf16 %v89_v14, %v85_v13  ;;  %v1400_v26 = vpack.c.bf16 %v87_v18, %v83_v17  ;;  %v1434_v27 = vpack.c.bf16 %v98_v22, %v94_v21  ;;  %v93_v28 = vld [vmem:[%s2009_s5 + $0x1d0] sm:$0xff]  ;;  %v101_v37 = vlaneseq  ;;  %s1536_s21 = smov 96   ;;  %s1539_s16 = smov [#allocation3]  }
  0x1a   :  { %v96_v24 = vld [vmem:[%s2009_s5 + $0x1e8] sm:$0xff]  ;;  %1429 = vmatpush1.bf16.msra.mxu1 %v1428_v12  ;;  %v97_v29 = vld [vmem:[%s2009_s5 + $0x1f0] sm:$0xff]  ;;  %v91_v31 = vld [vmem:[%s2009_s5 + $0x1c0] sm:$0xff]  ;;  %vm320_vm0 = vcmask 261120   ;;  %v1537_v6 = vmov -1e+09  }
  0x1b   :  { %1397 = vmatpush1.bf16.msra.mxu0 %v1396_v15  ;;  %1431 = vmatprep.subr.bf16.mxu1 %v1430_v16  ;;  %v1402_v30 = vpack.c.bf16 %v96_v24, %v92_v23  ;;  %v95_v32 = vld [vmem:[%s2009_s5 + $0x1e0] sm:$0xff]  ;;  %v1436_v33 = vpack.c.bf16 %v97_v29, %v93_v28  ;;  %v34_v36 = vld [vmem:[%s2004_s0 + $0x8] sm:$0xff]  ;;  %v102_v38 = vshrl.u32 %v101_v37, 7  ;;  %v314_v5 = vand.u32 127, %v101_v37  ;;  %s1225_s5 = sshll.u32 %s1539_s16, 4  ;;  %s1226_s5 = int_to_ptr.vmem [resolvable:$true] %s1225_s5 }
  0x1c   :  { %1399 = vmatprep.subr.bf16.mxu0 %v1398_v20  ;;  %v1404_v34 = vpack.c.bf16 %v95_v32, %v91_v31  ;;  %v33_v35 = vld [vmem:[%s2004_s0] sm:$0xff]  ;;  %vm403_vm2 = vcmask 64512   ;;  %vm512_vm3 = vcmask 523520   ;;  %vm712_vm4 = vcmask 785920   ;;  %p1515_p1 = scmp.lt.s32.totalorder %s1226_s5, %s1226_s5 }
  0x1d   :  { %v111_v39 = vsub.s32 2, %v102_v38  ;;  %v99_v40 = vld [vmem:[%s2010_s6] sm:$0xf]  ;;  %v103_v41 = vsub.s32 0, %v102_v38  ;;  %v107_v42 = vsub.s32 1, %v102_v38  ;;  %v115_v61 = vsub.s32 3, %v102_v38 }
  0x1e   :  { %1433 = vmatpush1.bf16.msra.mxu1 %v1432_v25  ;;  %v275_v50 = vld [vmem:[%s2005_s1] sm:$0xff]  ;;  %vm315_vm1 = vcmp.ge.s32.totalorder %v102_v38, %v314_v5  ;;  %vm718_vm5 = vcmask 1048320  }
  0x1f   :  { %1401 = vmatpush1.bf16.msra.mxu0 %v1400_v26  ;;  %1435 = vmatprep.subr.bf16.mxu1 %v1434_v27  ;;  %v1801_v43 = vrot.slane %v99_v40, %v111_v39  ;;  %v1803_v44 = vrot.slane %v99_v40, %v103_v41  ;;  %v279_v53 = vld [vmem:[%s2006_s2] sm:$0xff]  ;;  %v1826_v63 = vrot.slane %v99_v40, %v115_v61  ;;  %v1836_v8 = vsel %vm315_vm1, 0.0, %v1537_v6 }
  0x20   :  { %1403 = vmatprep.subr.bf16.mxu0 %v1402_v30  ;;  %v285_v62 = vld [vmem:[%s2007_s3] sm:$0xff] }
  0x22   :  { %1437 = vmatpush1.bf16.msra.mxu1 %v1436_v33 }
  0x23   :  { %1405 = vmatpush1.bf16.msra.mxu0 %v1404_v34 }
  0x25   :  { %263 = vmatmul.mubr.f32.vlgmr.msra.gmra.mrb[0].mxu1 %v33_v35 }
  0x26   :  { %186 = vmatmul.mubr.f32.vlgmr.msra.gmra.mrb[0].mxu0 %v33_v35  ;;  %268 = vmatprep.mubr.f32.mxu1 %v1534_v7 }
  0x27   :  { %191 = vmatprep.mubr.f32.mxu0 %v1534_v7  ;;  %v1805_v7 = vrot.slane %v99_v40, %v107_v42  ;;  %v290_v42 = vld [vmem:[%s2008_s4 + $0x8] sm:$0xff] }
  0x29   :  { %269 = vmatmul.mubr.f32.gmra.mrb[2].mxu1 %v34_v36 }
  0x2a   :  { %192 = vmatmul.mubr.f32.gmra.mrb[2].mxu0 %v34_v36 }
  0x88   :  { %v294_v46 = vpop.permute.xlu0 %293 }
  0xf8   :  { %v264_v45 = vpop.f32.mrb[0].mxu1 }
  0xf9   :  { %v265_v47 = vadd.f32 %v264_v45, %v1801_v43  ;;  %v266_v48 = vpop.f32.mrb[1].mxu1  ;;  %v187_v49 = vpop.f32.mrb[0].mxu0 }
  0xfa   :  { %v188_v51 = vadd.f32 %v187_v49, %v1803_v44  ;;  %v189_v52 = vpop.f32.mrb[1].mxu0  ;;  %v1829_v3 = vadd.f32 %v266_v48, %v1826_v63  ;;  %v280_v49 = vld [vmem:[%s2006_s2 + $0x8] sm:$0xff] }
  0xfb   :  { %v299_v54 = vmul.f32 %v294_v46, %v265_v47  ;;  %v190_v55 = vadd.f32 %v189_v52, %v1805_v7  ;;  %v287_v0 = vmul.f32 %v285_v62, %v265_v47  ;;  %v276_v46 = vld [vmem:[%s2005_s1 + $0x8] sm:$0xff] }
  0xfc   :  { %v277_v56 = vmul.f32 %v275_v50, %v188_v51  ;;  %v1819_v59 = vpop.f32.mrb[2].mxu1 }
  0xfd   :  { %v281_v57 = vmul.f32 %v279_v53, %v190_v55  ;;  %303 = vrot.lane.b32.xlu0 %v299_v54, %s1535_s22  ;;  %v1821_v60 = vpop.f32.mrb[3].mxu1  ;;  %v193_v45 = vpop.f32.mrb[2].mxu0  ;;  %v271_v61 = vadd.f32 %v1819_v59, %v1801_v43  ;;  %v286_v59 = vld [vmem:[%s2007_s3 + $0x8] sm:$0xff]  ;;  %s1538_s3 = smov 32  }
  0xfe   :  { %v194_v47 = vadd.f32 %v193_v45, %v1803_v44  ;;  %v195_v48 = vpop.f32.mrb[3].mxu0 }
  0xff   :  { %v283_v58 = vadd.f32 %v281_v57, %v277_v56  ;;  %v196_v50 = vadd.f32 %v195_v48, %v1805_v7 }
 0x100   :  { %v278_v51 = vmul.f32 %v276_v46, %v194_v47 }
 0x101   :  { %318 = vrot.lane.b32.xlu1 %v283_v58, %s1536_s21  ;;  %1301 = vmatprep.mubr.msk.f32.mxu1 %vm320_vm0, %v283_v58  ;;  %v282_v52 = vmul.f32 %v280_v49, %v196_v50 }
 0x103   :  { %v1872_v53 = vadd.f32 %v282_v52, %v278_v51 }
 0x16f   :  { %v304_v1 = vpop.permute.xlu0 %303 }
 0x170   :  { %v309_v2 = vadd.f32 %v304_v1, %v287_v0 }
 0x172   :  { %1299 = vmatprep.subr.msk.mxu1 %vm320_vm0, %v309_v2 }
 0x173   :  { %1300 = vmatpush3.xpose.msk.msra.mxu1 %vm320_vm0, %v309_v2  ;;  %v319_v4 = vpop.permute.xlu1 %318 }
 0x174   :  { %1304 = vmatprep.subr.mxu1 %v1829_v3 }
 0x176   :  { %1302 = vmatmul.mubr.msk.f32.vlgmr.msra.gmra.mrb[4].mxu1 %vm320_vm0, %v319_v4 }
 0x177   :  { %1305 = vmatpush3.msra.mxu1 %v1829_v3 }
 0x249   :  { %v1303_v9 = vpop.f32.mrb[4].mxu1 }
 0x24a   :  { %v400_v10 = vadd.f32 %v1303_v9, %v1836_v8  ;;  %v394_v11 = vpop.f32.mrb[5].mxu1  ;;  %v288_v9 = vmul.f32 %v286_v59, %v271_v61 }
 0x24b   :  { %v395_v12 = vadd.f32 %v394_v11, %v1836_v8 }
 0x24c   :  { %v407_v13 = vsel %vm403_vm2, %v400_v10, -inf }
 0x24d   :  { %408 = vmax.xlane.f32.xlu0 %v407_v13  ;;  %v404_v14 = vsel %vm403_vm2, %v395_v12, -inf }
 0x24e   :  { %405 = vmax.xlane.f32.xlu1 %v404_v14 }
 0x2da   :  { %v409_v15 = vpop.xlane.xlu0 %408 }
 0x2db   :  { %v411_v16 = vsub.f32 %v400_v10, %v409_v15  ;;  %v406_v17 = vpop.xlane.xlu1 %405  ;;  %v1890_v15 = vadd.f32 %v1821_v60, %v1826_v63 }
 0x2dc   :  { %v410_v18 = vsub.f32 %v395_v12, %v406_v17 }
 0x2dd   :  { %v414_v19 = vmul.f32 1.442695, %v411_v16 }
 0x2de   :  { %v412_v20 = vmul.f32 1.442695, %v410_v18 }
 0x2df   :  { %1478 = vpow2.f32 %v414_v19 }
 0x2e0   :  { %1480 = vpow2.f32 %v412_v20 }
 0x2e9   :  { %v1479_v21 = vpop.eup %1478 }
 0x2ea   :  { %v1481_v22 = vpop.eup %1480  ;;  %v419_v23 = vsel %vm403_vm2, %v1479_v21, 0.0 }
 0x2eb   :  { %420 = vadd.xlane.f32.xlu1 %v419_v23  ;;  %v416_v24 = vsel %vm403_vm2, %v1481_v22, 0.0 }
 0x2ec   :  { %417 = vadd.xlane.f32.xlu0 %v416_v24 }
 0x2fc   :  { %514 = vrot.lane.b32.xlu1 %v283_v58, %s1535_s22 }
 0x300   :  { %516 = vrot.lane.b32.xlu1 %v319_v4, %s1535_s22 }
 0x302   :  { %518 = vrot.lane.b32.xlu0 %v309_v2, %s1536_s21 }
 0x378   :  { %v421_v25 = vpop.xlane.xlu1 %420 }
 0x379   :  { %1482 = vrcp.f32 %v421_v25  ;;  %v418_v26 = vpop.xlane.xlu0 %417 }
 0x37a   :  { %1484 = vrcp.f32 %v418_v26 }
 0x37c   :  { %v515_v30 = vpop.permute.xlu1 %514 }
 0x37d   :  { %v519_v27 = vpop.permute.xlu0 %518 }
 0x37e   :  { %1309 = vmatprep.subr.msk.mxu1 %vm320_vm0, %v519_v27 }
 0x380   :  { %v517_v33 = vpop.permute.xlu1 %516 }
 0x383   :  { %v1483_v28 = vpop.eup %1482 }
 0x384   :  { %v1485_v29 = vpop.eup %1484  ;;  %v425_v32 = vmul.f32 %v1483_v28, %v1479_v21 }
 0x385   :  { %v424_v31 = vmul.f32 %v1485_v29, %v1481_v22 }
 0x387   :  { %1306 = vmatprep.mubr.msk.f32.mxu1 %vm403_vm2, %v424_v31 }
 0x388   :  { %1307 = vmatmul.mubr.msk.f32.vlgmr.msra.gmra.mrb[6].mxu1 %vm403_vm2, %v425_v32 }
 0x389   :  { %1310 = vmatpush3.xpose.msk.msra.mxu1 %vm320_vm0, %v519_v27  ;;  %1311 = vmatprep.mubr.msk.f32.mxu1 %vm320_vm0, %v515_v30 }
 0x38c   :  { %1312 = vmatmul.mubr.msk.f32.vlgmr.msra.gmra.mrb[8].mxu1 %vm320_vm0, %v517_v33 }
 0x45b   :  { %v1853_v34 = vpop.f32.mrb[6].mxu1 }
 0x45c   :  { %v498_v35 = vpop.f32.mrb[7].mxu1 }
 0x45d   :  { %507 = vst.msk [vmem:[#allocation2] sm:$0xff] %vm320_vm0, %v498_v35 }
 0x45f   :  { %v1313_v36 = vpop.f32.mrb[8].mxu1 }
 0x460   :  { %v598_v37 = vadd.f32 %v1313_v36, %v1836_v8  ;;  %v592_v38 = vpop.f32.mrb[9].mxu1 }
 0x461   :  { %v593_v39 = vadd.f32 %v592_v38, %v1836_v8 }
 0x462   :  { %v604_v40 = vsel %vm403_vm2, %v598_v37, -inf }
 0x463   :  { %605 = vmax.xlane.f32.xlu1 %v604_v40  ;;  %v601_v41 = vsel %vm403_vm2, %v593_v39, -inf }
 0x464   :  { %602 = vmax.xlane.f32.xlu0 %v601_v41 }
 0x47a   :  { %295 = vrot.lane.b32.xlu0 %v290_v42, %s1535_s22 }
 0x4f0   :  { %v606_v54 = vpop.xlane.xlu1 %605 }
 0x4f1   :  { %v608_v55 = vsub.f32 %v598_v37, %v606_v54  ;;  %v603_v56 = vpop.xlane.xlu0 %602 }
 0x4f2   :  { %v607_v57 = vsub.f32 %v593_v39, %v603_v56 }
 0x4f3   :  { %v611_v58 = vmul.f32 1.442695, %v608_v55 }
 0x4f4   :  { %v609_v44 = vmul.f32 1.442695, %v607_v57 }
 0x4f5   :  { %1486 = vpow2.f32 %v611_v58  ;;  %v296_v62 = vpop.permute.xlu0 %295 }
 0x4f6   :  { %v300_v0 = vmul.f32 %v296_v62, %v271_v61  ;;  %1488 = vpow2.f32 %v609_v44 }
 0x4f8   :  { %305 = vrot.lane.b32.xlu0 %v300_v0, %s1535_s22 }
 0x4fc   :  { %721 = vrot.lane.b32.xlu0 %v1872_v53, %s1536_s21 }
 0x4ff   :  { %v1487_v7 = vpop.eup %1486 }
 0x500   :  { %v616_v1 = vsel %vm403_vm2, %v1487_v7, 0.0  ;;  %v1489_v2 = vpop.eup %1488 }
 0x501   :  { %617 = vadd.xlane.f32.xlu1 %v616_v1  ;;  %v613_v4 = vsel %vm403_vm2, %v1489_v2, 0.0 }
 0x505   :  { %614 = vadd.xlane.f32.xlu1 %v613_v4 }
 0x516   :  { %624 = vrot.lane.b32.xlu1 %v1829_v3, %s1536_s21 }
 0x56a   :  { %v306_v6 = vpop.permute.xlu0 %305 }
 0x56b   :  { %v310_v11 = vadd.f32 %v306_v6, %v288_v9 }
 0x56e   :  { %v722_v16 = vpop.permute.xlu0 %721 }
 0x58e   :  { %v618_v43 = vpop.xlane.xlu1 %617 }
 0x58f   :  { %1490 = vrcp.f32 %v618_v43 }
 0x592   :  { %v615_v5 = vpop.xlane.xlu1 %614 }
 0x593   :  { %1492 = vrcp.f32 %v615_v5 }
 0x596   :  { %v625_v10 = vpop.permute.xlu1 %624 }
 0x597   :  { %1314 = vmatprep.subr.mxu1 %v625_v10 }
 0x598   :  { %1315 = vmatpush3.msra.mxu1 %v625_v10 }
 0x599   :  { %1319 = vmatprep.subr.msk.mxu1 %vm320_vm0, %v310_v11  ;;  %v1491_v12 = vpop.eup %1490 }
 0x59a   :  { %v622_v3 = vmul.f32 %v1491_v12, %v1487_v7  ;;  %v1121_v12 = vld [vmem:[%s2011_s7 + $0x8] sm:$0xff] }
 0x59d   :  { %v1493_v13 = vpop.eup %1492 }
 0x59e   :  { %v621_v14 = vmul.f32 %v1493_v13, %v1489_v2  ;;  %v1122_v13 = vld [vmem:[%s2011_s7 + $0x10] sm:$0xff] }
 0x5a0   :  { %1316 = vmatprep.mubr.msk.f32.mxu1 %vm403_vm2, %v621_v14 }
 0x5a1   :  { %1317 = vmatmul.mubr.msk.f32.vlgmr.msra.gmra.mrb[10].mxu1 %vm403_vm2, %v622_v3  ;;  %v1123_v3 = vld [vmem:[%s2011_s7 + $0x18] sm:$0xff] }
 0x5a2   :  { %1320 = vmatpush3.xpose.msk.msra.mxu1 %vm320_vm0, %v310_v11  ;;  %1321 = vmatprep.mubr.msk.f32.mxu1 %vm320_vm0, %v1872_v53 }
 0x5a3   :  { %1324 = vmatprep.subr.mxu1 %v1890_v15 }
 0x5a5   :  { %1322 = vmatmul.mubr.msk.f32.vlgmr.msra.gmra.mrb[12].mxu1 %vm320_vm0, %v722_v16 }
 0x5a6   :  { %1325 = vmatpush3.msra.mxu1 %v1890_v15 }
 0x674   :  { %v1899_v17 = vpop.f32.mrb[10].mxu1 }
 0x675   :  { %v1901_v18 = vpop.f32.mrb[11].mxu1 }
 0x678   :  { %v1323_v60 = vpop.f32.mrb[12].mxu1 }
 0x679   :  { %v802_v63 = vadd.f32 %v1323_v60, %v1836_v8  ;;  %v796_v19 = vpop.f32.mrb[13].mxu1  ;;  %v1126_v60 = vld [vmem:[%s2011_s7 + $0x30] sm:$0xff] }
 0x67a   :  { %v797_v20 = vadd.f32 %v796_v19, %v1836_v8 }
 0x67b   :  { %v808_v21 = vsel %vm403_vm2, %v802_v63, -inf }
 0x67c   :  { %809 = vmax.xlane.f32.xlu1 %v808_v21  ;;  %v805_v22 = vsel %vm403_vm2, %v797_v20, -inf  ;;  %v1129_v21 = vld [vmem:[%s2011_s7 + $0x48] sm:$0xff] }
 0x67d   :  { %806 = vmax.xlane.f32.xlu0 %v805_v22 }
 0x68d   :  { %918 = vrot.lane.b32.xlu1 %v310_v11, %s1536_s21  ;;  %v1120_v11 = vld [vmem:[%s2011_s7] sm:$0xff] }
 0x68e   :  { %v1438_v14 = vpack.c.bf16 %v1121_v12, %v1120_v11 }
 0x690   :  { %1439 = vmatprep.subr.bf16.mxu0 %v1438_v14 }
 0x691   :  { %916 = vrot.lane.b32.xlu1 %v722_v16, %s1535_s22  ;;  %v1124_v16 = vld [vmem:[%s2011_s7 + $0x20] sm:$0xff]  ;;  %1441 = vmatpush3.bf16.msra.mxu0 %v1438_v14 }
 0x709   :  { %v810_v23 = vpop.xlane.xlu1 %809 }
 0x70a   :  { %v812_v24 = vsub.f32 %v802_v63, %v810_v23  ;;  %v807_v25 = vpop.xlane.xlu0 %806  ;;  %v1127_v63 = vld [vmem:[%s2011_s7 + $0x38] sm:$0xff]  ;;  %v1130_v23 = vld [vmem:[%s2011_s7 + $0x50] sm:$0xff] }
 0x70b   :  { %v811_v26 = vsub.f32 %v797_v20, %v807_v25  ;;  %v1450_v19 = vpack.c.bf16 %v1127_v63, %v1126_v60  ;;  %v1128_v20 = vld [vmem:[%s2011_s7 + $0x40] sm:$0xff] }
 0x70c   :  { %v815_v27 = vmul.f32 1.442695, %v812_v24  ;;  %v1454_v22 = vpack.c.bf16 %v1129_v21, %v1128_v20  ;;  %v1131_v24 = vld [vmem:[%s2011_s7 + $0x58] sm:$0xff] }
 0x70d   :  { %v813_v28 = vmul.f32 1.442695, %v811_v26  ;;  %v919_v29 = vpop.permute.xlu1 %918  ;;  %v1458_v25 = vpack.c.bf16 %v1131_v24, %v1130_v23  ;;  %v1132_v26 = vld [vmem:[%s2011_s7 + $0x60] sm:$0xff] }
 0x70e   :  { %1494 = vpow2.f32 %v815_v27  ;;  %1329 = vmatprep.subr.msk.mxu1 %vm320_vm0, %v919_v29  ;;  %v1133_v27 = vld [vmem:[%s2011_s7 + $0x68] sm:$0xff] }
 0x70f   :  { %1496 = vpow2.f32 %v813_v28  ;;  %v1462_v28 = vpack.c.bf16 %v1133_v27, %v1132_v26 }
 0x711   :  { %v917_v42 = vpop.permute.xlu1 %916 }
 0x718   :  { %v1495_v30 = vpop.eup %1494 }
 0x719   :  { %v820_v31 = vsel %vm403_vm2, %v1495_v30, 0.0  ;;  %v1497_v32 = vpop.eup %1496 }
 0x71a   :  { %821 = vadd.xlane.f32.xlu0 %v820_v31  ;;  %v817_v33 = vsel %vm403_vm2, %v1497_v32, 0.0 }
 0x71e   :  { %818 = vadd.xlane.f32.xlu0 %v817_v33 }
 0x734   :  { %914 = vrot.lane.b32.xlu0 %v1872_v53, %s1535_s22 }
 0x7a7   :  { %v822_v35 = vpop.xlane.xlu0 %821 }
 0x7a8   :  { %1498 = vrcp.f32 %v822_v35 }
 0x7ab   :  { %v819_v36 = vpop.xlane.xlu0 %818 }
 0x7ac   :  { %1500 = vrcp.f32 %v819_v36 }
 0x7af   :  { %v915_v41 = vpop.permute.xlu0 %914 }
 0x7b2   :  { %v1499_v37 = vpop.eup %1498 }
 0x7b3   :  { %v826_v40 = vmul.f32 %v1499_v37, %v1495_v30  ;;  %v1135_v30 = vld [vmem:[%s2011_s7 + $0x78] sm:$0xff] }
 0x7b6   :  { %v1501_v38 = vpop.eup %1500 }
 0x7b7   :  { %v825_v39 = vmul.f32 %v1501_v38, %v1497_v32  ;;  %v1256_v38 = vld [vmem:[%s2012_s8] ss:$0 sm:$0xff] }
 0x7b9   :  { %1326 = vmatprep.mubr.msk.f32.mxu1 %vm403_vm2, %v825_v39 }
 0x7ba   :  { %1327 = vmatmul.mubr.msk.f32.vlgmr.msra.gmra.mrb[14].mxu1 %vm403_vm2, %v826_v40 }
 0x7bb   :  { %1330 = vmatpush3.xpose.msk.msra.mxu1 %vm320_vm0, %v919_v29  ;;  %1331 = vmatprep.mubr.msk.f32.mxu1 %vm320_vm0, %v915_v41  ;;  %v1134_v29 = vld [vmem:[%s2011_s7 + $0x70] sm:$0xff] }
 0x7bc   :  { %v1466_v31 = vpack.c.bf16 %v1135_v30, %v1134_v29 }
 0x7be   :  { %1332 = vmatmul.mubr.msk.f32.vlgmr.msra.gmra.mrb[16].mxu1 %vm320_vm0, %v917_v42 }
 0x88d   :  { %v1328_v45 = vpop.f32.mrb[14].mxu1 }
 0x88e   :  { %v899_v46 = vpop.f32.mrb[15].mxu1 }
 0x88f   :  { %908 = vst.msk [vmem:[#allocation2 + $0x8] sm:$0xff] %vm320_vm0, %v899_v46 }
 0x891   :  { %v1333_v47 = vpop.f32.mrb[16].mxu1 }
 0x892   :  { %v998_v48 = vadd.f32 %v1333_v47, %v1836_v8  ;;  %v992_v49 = vpop.f32.mrb[17].mxu1 }
 0x893   :  { %v993_v50 = vadd.f32 %v992_v49, %v1836_v8 }
 0x894   :  { %v1004_v51 = vsel %vm403_vm2, %v998_v48, -inf }
 0x895   :  { %1005 = vmax.xlane.f32.xlu0 %v1004_v51  ;;  %v1001_v52 = vsel %vm403_vm2, %v993_v50, -inf }
 0x896   :  { %1002 = vmax.xlane.f32.xlu1 %v1001_v52 }
 0x922   :  { %v1006_v53 = vpop.xlane.xlu0 %1005 }
 0x923   :  { %v1008_v54 = vsub.f32 %v998_v48, %v1006_v53  ;;  %v1003_v55 = vpop.xlane.xlu1 %1002 }
 0x924   :  { %v1007_v56 = vsub.f32 %v993_v50, %v1003_v55 }
 0x925   :  { %v1011_v57 = vmul.f32 1.442695, %v1008_v54 }
 0x926   :  { %v1009_v58 = vmul.f32 1.442695, %v1007_v56 }
 0x927   :  { %1502 = vpow2.f32 %v1011_v57 }
 0x928   :  { %1504 = vpow2.f32 %v1009_v58 }
 0x931   :  { %v1503_v61 = vpop.eup %1502 }
 0x932   :  { %v1505_v44 = vpop.eup %1504  ;;  %v1016_v62 = vsel %vm403_vm2, %v1503_v61, 0.0 }
 0x933   :  { %1017 = vadd.xlane.f32.xlu1 %v1016_v62  ;;  %v1013_v8 = vsel %vm403_vm2, %v1505_v44, 0.0 }
 0x934   :  { %1014 = vadd.xlane.f32.xlu0 %v1013_v8 }
 0x944   :  { %509 = vrot.lane.b32.xlu1 %v1853_v34, %s1538_s3 }
 0x948   :  { %709 = vrot.lane.b32.xlu1 %v1901_v18, %s1535_s22 }
 0x94a   :  { %1024 = vrot.lane.b32.xlu0 %v1890_v15, %s1536_s21  ;;  %v1442_v15 = vpack.c.bf16 %v1123_v3, %v1122_v13 }
 0x94c   :  { %715 = vrot.lane.b32.xlu1 %v1899_v17, %s1536_s21  ;;  %v1125_v17 = vld [vmem:[%s2011_s7 + $0x28] sm:$0xff]  ;;  %1443 = vmatprep.subr.bf16.mxu0 %v1442_v15 }
 0x94d   :  { %v1446_v18 = vpack.c.bf16 %v1125_v17, %v1124_v16  ;;  %1445 = vmatpush3.bf16.msra.mxu0 %v1442_v15 }
 0x94e   :  { %910 = vrot.lane.b32.xlu0 %v1328_v45, %s1538_s3 }
 0x94f   :  { %1447 = vmatprep.subr.bf16.mxu0 %v1446_v18 }
 0x951   :  { %1449 = vmatpush3.bf16.msra.mxu0 %v1446_v18 }
 0x952   :  { %1451 = vmatprep.subr.bf16.mxu0 %v1450_v19 }
 0x955   :  { %1453 = vmatpush3.bf16.msra.mxu0 %v1450_v19 }
 0x956   :  { %1455 = vmatprep.subr.bf16.mxu0 %v1454_v22 }
 0x959   :  { %1457 = vmatpush3.bf16.msra.mxu0 %v1454_v22 }
 0x95a   :  { %1459 = vmatprep.subr.bf16.mxu0 %v1458_v25 }
 0x95d   :  { %1461 = vmatpush3.bf16.msra.mxu0 %v1458_v25 }
 0x95e   :  { %1463 = vmatprep.subr.bf16.mxu0 %v1462_v28 }
 0x961   :  { %1465 = vmatpush3.bf16.msra.mxu0 %v1462_v28 }
 0x962   :  { %1467 = vmatprep.subr.bf16.mxu0 %v1466_v31 }
 0x965   :  { %1469 = vmatpush3.bf16.msra.mxu0 %v1466_v31 }
 0x9c0   :  { %v1018_v0 = vpop.xlane.xlu1 %1017 }
 0x9c1   :  { %1506 = vrcp.f32 %v1018_v0  ;;  %v1015_v7 = vpop.xlane.xlu0 %1014 }
 0x9c2   :  { %1508 = vrcp.f32 %v1015_v7 }
 0x9c4   :  { %v510_v1 = vpop.permute.xlu1 %509 }
 0x9c5   :  { %513 = vst.msk [vmem:[#allocation2] sm:$0xff] %vm512_vm3, %v510_v1  ;;  %v1025_v2 = vpop.permute.xlu0 %1024 }
 0x9c6   :  { %1334 = vmatprep.subr.mxu1 %v1025_v2 }
 0x9c7   :  { %1335 = vmatpush3.msra.mxu1 %v1025_v2 }
 0x9c8   :  { %v710_v34 = vpop.permute.xlu1 %709 }
 0x9c9   :  { %713 = vst.msk [vmem:[#allocation2] sm:$0xff] %vm712_vm4, %v710_v34  ;;  %v911_v4 = vpop.permute.xlu0 %910 }
 0x9ca   :  { %913 = vst.msk [vmem:[#allocation2 + $0x8] sm:$0xff] %vm512_vm3, %v911_v4 }
 0x9cb   :  { %v1507_v43 = vpop.eup %1506 }
 0x9cc   :  { %v1509_v59 = vpop.eup %1508  ;;  %v716_v5 = vpop.permute.xlu1 %715  ;;  %v1022_v9 = vmul.f32 %v1507_v43, %v1503_v61 }
 0x9cd   :  { %719 = vst.msk [vmem:[#allocation2] sm:$0xff] %vm718_vm5, %v716_v5  ;;  %v1021_v6 = vmul.f32 %v1509_v59, %v1505_v44 }
 0x9cf   :  { %1336 = vmatprep.mubr.msk.f32.mxu1 %vm403_vm2, %v1021_v6 }
 0x9d0   :  { %1337 = vmatmul.mubr.msk.f32.vlgmr.msra.gmra.mrb[18].mxu1 %vm403_vm2, %v1022_v9 }
 0x9d4   :  { %v1118_v10 = vld [vmem:[#allocation2] sm:$0xff] }
 0x9d5   :  { %1371 = vmatprep.mubr.f32.mxu0 %v1118_v10 }
 0xaa3   :  { %v1338_v32 = vpop.f32.mrb[18].mxu1 }
 0xaa4   :  { %1114 = vrot.lane.b32.xlu1 %v1338_v32, %s1536_s21  ;;  %v1099_v33 = vpop.f32.mrb[19].mxu1 }
 0xaa5   :  { %1109 = vrot.lane.b32.xlu0 %v1099_v33, %s1535_s22  ;;  %s1510_s22 = scalar_lea.vmem %s1226_s5, 256 }
 0xaa6   :  { %p1511_p0 = scmp.ne.s32.totalorder %s1226_s5, %s1510_s22  ;;  %p1516_p2 = scmp.lt.s32.totalorder %s1510_s22, %s1510_s22 }
 0xaa8   :  { %p1517_p3 = por %p1516_p2, %p1515_p1 }
 0xaaa   :  { %p1518_p4 = pnand %p1517_p3, %p1511_p0 }
 0xb16   :  { %v1115_v36 = vpop.permute.xlu1 %1114 }
 0xb17   :  { %v1110_v35 = vpop.permute.xlu0 %1109 }
 0xb18   :  { %1112 = vst.msk [vmem:[#allocation2 + $0x8] sm:$0xff] %vm712_vm4, %v1110_v35 }
 0xb19   :  { %1117 = vst.msk [vmem:[#allocation2 + $0x8] sm:$0xff] %vm718_vm5, %v1115_v36 }
 0xb20   :  { %v1119_v37 = vld [vmem:[#allocation2 + $0x8] sm:$0xff] }
 0xb21   :  { %1372 = vmatmul.mubr.f32.vlgmr.msra.gmra.mrb[4].mxu0 %v1119_v37 }
 0xbf4   :  { %v1373_v39 = vpop.f32.mrb[4].mxu0 }
 0xbf5   :  { %v1215_v40 = vadd.f32 %v1373_v39, %v1256_v38  ;;  %v1209_v41 = vpop.f32.mrb[5].mxu0 }
 0xbf6   :  { %v1210_v42 = vadd.f32 %v1256_v38, %v1209_v41 }
 0xbf7   :  { %1219 = vst [vmem:[#allocation3 + $0x8] sm:$0xff] %v1215_v40 }
 0xbf8   :  { %1218 = vst [vmem:[#allocation3] sm:$0xff] %v1210_v42 }
 0xbf9   :  { %1521 = shalt.err (!%p1518_p4)
}
 0xbfa   :  { %s1522_s8 = scalar_lea.hbm %s2013_s9, 256 }
 0xbfb   :  { %p1523_p5 = scmp.ne.s32.totalorder %s2013_s9, %s1522_s8  ;;  %p1526_p6 = scmp.lt.u32.totalorder %s1522_s8, %s2013_s9 }
 0xbfd   :  { %p1528_p7 = pnand %p1526_p6, %p1523_p5 }
 0xbff   :  { %1531 = shalt.err (!%p1528_p7)
}
 0xc00   :  { %s1540_s20 = smov 128   ;;  %s1541_s23 = smov 8  }
 0xc01   :  { %1231 = dma.vmem_to_hbm [thread:$0]  %s1226_s5, 256, %s2013_s9, [#allocation4], %s1540_s20, %s1540_s20, %s1541_s23  }
 0xc02   :  { %1532 = dma.done.wait [#allocation4], 256  }
 0xc03   :  { %1533 = vsyncadd [#allocation4], 4294967040 }
 0xc04   :  { %1235 = vsyncpa [#allocation4], 1 }

</bundles_post_ra>
